<compile_context>
chip_gen: v6e
topology: v6e:2x2x1
jax: 0.10.0
libtpu: 0.0.40
codegen_flags: <defaults>
</compile_context>

<pallas_src>
import functools

import jax
import jax.numpy as jnp
from jax.experimental import pallas as pl
from jax.experimental.pallas import tpu as pltpu


def _fused_mlp_kernel(x_ref, w_ref, o_ref, *, d_hidden):
    # x_ref: (1, C_in, T) input dtype; w_ref: (5, CH, CH) bf16 (zero-padded);
    # o_ref: (1, C_out, T).  Channels on sublanes, pixels on lanes.
    c_in = x_ref.shape[1]
    c_out = o_ref.shape[1]
    d = d_hidden

    # bf16 MXU operands, f32 accumulation, f32 nonlinearities.
    h = x_ref[0].astype(jnp.bfloat16)                                 # (C_in, T)
    h = jnp.dot(w_ref[0][:d, :c_in], h, preferred_element_type=jnp.float32)
    h = jnp.maximum(h, 0.0)
    for i in (1, 2, 3):
        h = jnp.dot(w_ref[i][:d, :d], h.astype(jnp.bfloat16),
                    preferred_element_type=jnp.float32)
        h = jnp.maximum(h, 0.0)
    h = jnp.dot(w_ref[4][:c_out, :d], h.astype(jnp.bfloat16),
                preferred_element_type=jnp.float32)
    o_ref[0] = jnp.tanh(h).astype(o_ref.dtype)


def _round_up(x, m):
    return pl.cdiv(x, m) * m


def weight_dist_deep_pallas(x_nchw, w1, w2, w3, w4, w5, *,
                            tile_hw=4096, out_dtype=None):
    """Fused 5-layer 1x1-conv MLP (ReLU x4, Tanh) over an NCHW input.

    x_nchw: (N, C_in, H, W) float32.  w_i: (C_next, C_prev) — PyTorch Conv2d
    weights with the 1x1 spatial dims squeezed.  Returns (N, C_out, H, W).
    out_dtype: optional storage dtype for the output (e.g. jnp.bfloat16 to
    halve output HBM bytes — recommended on all generations, v5e most of all);
    accumulation is always f32 inside the kernel.
    """
    N, C_in, H, W = x_nchw.shape
    D = w1.shape[0]            # de_hidden
    C_out = w5.shape[0]        # (hidden + 1) * out_channels + 1
    HW = H * W
    LANE = 256                 # full 256-lane MXU stationary tiles on v6e/v7x

    # Lane-dense pixel tile: a multiple of 256, at most tile_hw, >= 256.
    tile = min(tile_hw, _round_up(HW, LANE))
    tile = max(LANE, (tile // LANE) * LANE)
    # v7x megacore: keep >= 2 "parallel" grid steps when the batch can't provide them.
    if N == 1 and HW > LANE:
        tile = min(tile, _round_up(pl.cdiv(HW, 2), LANE))

    # NCHW -> (N, C_in, H*W): free reshape, no extra HBM pass; no padding and
    # no wrapper-side dtype cast of x (ragged tail handled by edge masking).
    x = x_nchw.reshape(N, C_in, HW)
    out_dtype = x.dtype if out_dtype is None else out_dtype

    # Pack the five tiny weights into one zero-padded (5, CH, CH) bf16 block:
    # a single resident VMEM buffer with a constant index_map (DMA'd once),
    # and guaranteed single-pass bf16 MXU operands.
    CH = max(C_in, D, C_out)
    wpack = jnp.zeros((5, CH, CH), jnp.bfloat16)
    wpack = wpack.at[0, :D, :C_in].set(w1.astype(jnp.bfloat16))
    wpack = wpack.at[1, :D, :D].set(w2.astype(jnp.bfloat16))
    wpack = wpack.at[2, :D, :D].set(w3.astype(jnp.bfloat16))
    wpack = wpack.at[3, :D, :D].set(w4.astype(jnp.bfloat16))
    wpack = wpack.at[4, :C_out, :D].set(w5.astype(jnp.bfloat16))

    grid = (N, pl.cdiv(HW, tile))

    out = pl.pallas_call(
        functools.partial(_fused_mlp_kernel, d_hidden=D),
        out_shape=jax.ShapeDtypeStruct((N, C_out, HW), out_dtype),
        grid_spec=pltpu.PrefetchScalarGridSpec(
            num_scalar_prefetch=0,
            grid=grid,
            in_specs=[
                pl.BlockSpec((1, C_in, tile), lambda n, j: (n, 0, j)),
                pl.BlockSpec((5, CH, CH), lambda n, j: (0, 0, 0)),
            ],
            out_specs=pl.BlockSpec((1, C_out, tile), lambda n, j: (n, 0, j)),
        ),
        compiler_params=pltpu.CompilerParams(
            dimension_semantics=("parallel", "parallel"),
        ),
    )(x, wpack)

    # Free reshape (contiguous) — no post-call slice pass.
    return out.reshape(N, C_out, H, W)


def init_weights(key, in_channels, de_hidden, hidden, out_channels):
    """Deterministic init mimicking nn.Conv2d default (kaiming-uniform-ish),
    stored in PyTorch orientation (C_out, C_in)."""
    c_final = (hidden + 1) * out_channels + 1
    dims = [(de_hidden, in_channels),
            (de_hidden, de_hidden),
            (de_hidden, de_hidden),
            (de_hidden, de_hidden),
            (c_final, de_hidden)]
    keys = jax.random.split(key, len(dims))
    ws = []
    for k, (cout, cin) in zip(keys, dims):
        bound = 1.0 / jnp.sqrt(cin)  # fan_in = cin * 1 * 1
        ws.append(jax.random.uniform(k, (cout, cin), jnp.float32,
                                     minval=-bound, maxval=bound))
    return ws


def reference_forward(x_nchw, w1, w2, w3, w4, w5):
    # Pure-JAX reference of the same math (1x1 convs == channel matmuls).
    h = jnp.maximum(jnp.einsum("nchw,dc->ndhw", x_nchw, w1), 0.0)
    h = jnp.maximum(jnp.einsum("nchw,dc->ndhw", h, w2), 0.0)
    h = jnp.maximum(jnp.einsum("nchw,dc->ndhw", h, w3), 0.0)
    h = jnp.maximum(jnp.einsum("nchw,dc->ndhw", h, w4), 0.0)
    return jnp.tanh(jnp.einsum("nchw,dc->ndhw", h, w5))


if __name__ == "__main__":
    # Module hyperparameters (small, consistent with the forward pass).
    in_channels, de_hidden, hidden, out_channels = 4, 32, 8, 3
    N, H, W = 2, 16, 16
    C_out = (hidden + 1) * out_channels + 1  # 28

    key = jax.random.PRNGKey(0)
    kx, kw, kx2 = jax.random.split(key, 3)
    x = jax.random.normal(kx, (N, in_channels, H, W), jnp.float32)
    w1, w2, w3, w4, w5 = init_weights(kw, in_channels, de_hidden, hidden,
                                      out_channels)

    ref = reference_forward(x, w1, w2, w3, w4, w5)

    # f32-output path (bf16 MXU operands / f32 accumulation inside).
    out = jax.block_until_ready(weight_dist_deep_pallas(x, w1, w2, w3, w4, w5))
    assert out.shape == (N, C_out, H, W), out.shape
    err = float(jnp.max(jnp.abs(out - ref)))
    assert err < 5e-2, ("f32-output mismatch", err)

    # bf16-output HBM-streaming path.
    out_bf16 = jax.block_until_ready(
        weight_dist_deep_pallas(x, w1, w2, w3, w4, w5,
                                out_dtype=jnp.bfloat16))
    assert out_bf16.shape == (N, C_out, H, W), out_bf16.shape
    assert out_bf16.dtype == jnp.bfloat16
    err_bf16 = float(jnp.max(jnp.abs(out_bf16.astype(jnp.float32) - ref)))
    assert err_bf16 < 1e-1, ("bf16-output mismatch", err_bf16)

    # Ragged spatial size (H*W not a tile multiple): exercises the in-kernel
    # edge-block handling that replaced the wrapper pad + slice.
    H2, W2 = 20, 20
    x2 = jax.random.normal(kx2, (N, in_channels, H2, W2), jnp.float32)
    ref2 = reference_forward(x2, w1, w2, w3, w4, w5)
    out2 = jax.block_until_ready(weight_dist_deep_pallas(x2, w1, w2, w3, w4, w5))
    assert out2.shape == (N, C_out, H2, W2), out2.shape
    err2 = float(jnp.max(jnp.abs(out2 - ref2)))
    assert err2 < 5e-2, ("ragged-shape mismatch", err2)

    print("KERNEL_OK")
</pallas_src>

<mosaic_0001>
module attributes {stable_mosaic.version = 11 : i64} {
  func.func @_fused_mlp_kernel(%arg0: i32, %arg1: i32, %arg2: memref<1x4x256xf32, #tpu.memory_space<vmem>>, %arg3: memref<5x32x32xbf16, #tpu.memory_space<vmem>>, %arg4: memref<1x28x256xf32, #tpu.memory_space<vmem>>) attributes {dimension_semantics = [#tpu.dimension_semantics<parallel>, #tpu.dimension_semantics<parallel>], iteration_bounds = array<i64: 2, 1>, scalar_prefetch = 0 : i64, scratch_operands = 0 : i64, tpu.core_type = #tpu.core_type<tc>, window_params = [{transform_indices = @transform_0, window_bounds = array<i64: 1, 4, 256>}, {pipeline_mode = #tpu.pipeline_mode<synchronous>, transform_indices = @transform_1, window_bounds = array<i64: 5, 32, 32>}, {transform_indices = @transform_2, window_bounds = array<i64: 1, 28, 256>}]} {
    %c0 = arith.constant 0 : index
    %c0_0 = arith.constant 0 : index
    %c0_1 = arith.constant 0 : index
    %0 = vector.load %arg2[%c0, %c0_0, %c0_1] : memref<1x4x256xf32, #tpu.memory_space<vmem>>, vector<1x4x256xf32>
    %1 = vector.shape_cast %0 : vector<1x4x256xf32> to vector<4x256xf32>
    %2 = arith.truncf %1 : vector<4x256xf32> to vector<4x256xbf16>
    %c0_2 = arith.constant 0 : index
    %c0_3 = arith.constant 0 : index
    %c0_4 = arith.constant 0 : index
    %3 = vector.load %arg3[%c0_2, %c0_3, %c0_4] : memref<5x32x32xbf16, #tpu.memory_space<vmem>>, vector<1x32x32xbf16>
    %4 = vector.shape_cast %3 : vector<1x32x32xbf16> to vector<32x32xbf16>
    %5 = vector.extract_strided_slice %4 {offsets = [0, 0], sizes = [32, 4], strides = [1, 1]} : vector<32x32xbf16> to vector<32x4xbf16>
    %cst = arith.constant dense<0.000000e+00> : vector<32x256xf32>
    %6 = tpu.matmul %5, %2, %cst {dimension_numbers = #tpu.dot_dimension_numbers<[1], [0], [0], [1], [0, 0, 1, 1], [], []>} : vector<32x4xbf16>, vector<4x256xbf16>, vector<32x256xf32> -> vector<32x256xf32>
    %cst_5 = arith.constant 0.000000e+00 : f32
    %7 = vector.broadcast %cst_5 : f32 to vector<32x256xf32>
    %8 = arith.maximumf %6, %7 : vector<32x256xf32>
    %c1 = arith.constant 1 : index
    %c0_6 = arith.constant 0 : index
    %c0_7 = arith.constant 0 : index
    %9 = vector.load %arg3[%c1, %c0_6, %c0_7] : memref<5x32x32xbf16, #tpu.memory_space<vmem>>, vector<1x32x32xbf16>
    %10 = vector.shape_cast %9 : vector<1x32x32xbf16> to vector<32x32xbf16>
    %11 = arith.truncf %8 : vector<32x256xf32> to vector<32x256xbf16>
    %cst_8 = arith.constant dense<0.000000e+00> : vector<32x256xf32>
    %12 = tpu.matmul %10, %11, %cst_8 {dimension_numbers = #tpu.dot_dimension_numbers<[1], [0], [0], [1], [0, 0, 1, 1], [], []>} : vector<32x32xbf16>, vector<32x256xbf16>, vector<32x256xf32> -> vector<32x256xf32>
    %cst_9 = arith.constant 0.000000e+00 : f32
    %13 = vector.broadcast %cst_9 : f32 to vector<32x256xf32>
    %14 = arith.maximumf %12, %13 : vector<32x256xf32>
    %c2 = arith.constant 2 : index
    %c0_10 = arith.constant 0 : index
    %c0_11 = arith.constant 0 : index
    %15 = vector.load %arg3[%c2, %c0_10, %c0_11] : memref<5x32x32xbf16, #tpu.memory_space<vmem>>, vector<1x32x32xbf16>
    %16 = vector.shape_cast %15 : vector<1x32x32xbf16> to vector<32x32xbf16>
    %17 = arith.truncf %14 : vector<32x256xf32> to vector<32x256xbf16>
    %cst_12 = arith.constant dense<0.000000e+00> : vector<32x256xf32>
    %18 = tpu.matmul %16, %17, %cst_12 {dimension_numbers = #tpu.dot_dimension_numbers<[1], [0], [0], [1], [0, 0, 1, 1], [], []>} : vector<32x32xbf16>, vector<32x256xbf16>, vector<32x256xf32> -> vector<32x256xf32>
    %cst_13 = arith.constant 0.000000e+00 : f32
    %19 = vector.broadcast %cst_13 : f32 to vector<32x256xf32>
    %20 = arith.maximumf %18, %19 : vector<32x256xf32>
    %c3 = arith.constant 3 : index
    %c0_14 = arith.constant 0 : index
    %c0_15 = arith.constant 0 : index
    %21 = vector.load %arg3[%c3, %c0_14, %c0_15] : memref<5x32x32xbf16, #tpu.memory_space<vmem>>, vector<1x32x32xbf16>
    %22 = vector.shape_cast %21 : vector<1x32x32xbf16> to vector<32x32xbf16>
    %23 = arith.truncf %20 : vector<32x256xf32> to vector<32x256xbf16>
    %cst_16 = arith.constant dense<0.000000e+00> : vector<32x256xf32>
    %24 = tpu.matmul %22, %23, %cst_16 {dimension_numbers = #tpu.dot_dimension_numbers<[1], [0], [0], [1], [0, 0, 1, 1], [], []>} : vector<32x32xbf16>, vector<32x256xbf16>, vector<32x256xf32> -> vector<32x256xf32>
    %cst_17 = arith.constant 0.000000e+00 : f32
    %25 = vector.broadcast %cst_17 : f32 to vector<32x256xf32>
    %26 = arith.maximumf %24, %25 : vector<32x256xf32>
    %c4 = arith.constant 4 : index
    %c0_18 = arith.constant 0 : index
    %c0_19 = arith.constant 0 : index
    %27 = vector.load %arg3[%c4, %c0_18, %c0_19] : memref<5x32x32xbf16, #tpu.memory_space<vmem>>, vector<1x32x32xbf16>
    %28 = vector.shape_cast %27 : vector<1x32x32xbf16> to vector<32x32xbf16>
    %29 = vector.extract_strided_slice %28 {offsets = [0, 0], sizes = [28, 32], strides = [1, 1]} : vector<32x32xbf16> to vector<28x32xbf16>
    %30 = arith.truncf %26 : vector<32x256xf32> to vector<32x256xbf16>
    %cst_20 = arith.constant dense<0.000000e+00> : vector<28x256xf32>
    %31 = tpu.matmul %29, %30, %cst_20 {dimension_numbers = #tpu.dot_dimension_numbers<[1], [0], [0], [1], [0, 0, 1, 1], [], []>} : vector<28x32xbf16>, vector<32x256xbf16>, vector<28x256xf32> -> vector<28x256xf32>
    %32 = math.tanh %31 : vector<28x256xf32>
    %c0_21 = arith.constant 0 : index
    %c0_22 = arith.constant 0 : index
    %c0_23 = arith.constant 0 : index
    %33 = vector.load %arg4[%c0_21, %c0_22, %c0_23] : memref<1x28x256xf32, #tpu.memory_space<vmem>>, vector<1x28x256xf32>
    %34 = vector.shape_cast %33 : vector<1x28x256xf32> to vector<28x256xf32>
    %35 = vector.shape_cast %32 : vector<28x256xf32> to vector<1x28x256xf32>
    tpu.vector_store %arg4[%c0_21, %c0_22, %c0_23], %35 {strides = array<i32>} : memref<1x28x256xf32, #tpu.memory_space<vmem>>, vector<1x28x256xf32>,
    return
  }
  func.func @transform_0(%arg0: i32, %arg1: i32) -> (i32, i32, i32) {
    %c0_i32 = arith.constant 0 : i32
    %c0_i32_0 = arith.constant 0 : i32
    return %arg0, %c0_i32, %arg1 : i32, i32, i32
  }
  func.func @transform_1(%arg0: i32, %arg1: i32) -> (i32, i32, i32) {
    %c0_i32 = arith.constant 0 : i32
    %c0_i32_0 = arith.constant 0 : i32
    %c0_i32_1 = arith.constant 0 : i32
    %c0_i32_2 = arith.constant 0 : i32
    return %c0_i32, %c0_i32_0, %c0_i32_1 : i32, i32, i32
  }
  func.func @transform_2(%arg0: i32, %arg1: i32) -> (i32, i32, i32) {
    %c0_i32 = arith.constant 0 : i32
    %c0_i32_0 = arith.constant 0 : i32
    return %arg0, %c0_i32, %arg1 : i32, i32, i32
  }
}

</mosaic_0001>

<bundles_post_ra>
// kernel: tpu_custom_call.1
= control target key start
LH: loop header
LB: loop body
LE: loop exit
PB: predicated region body
PF: predicated region fallthrough
CT: control target
= control target key end

     0   :  { %7 = vsyncpa [#allocation3], 0  ;;  %s1164_s0 = inlined_call_operand.hbm [shape: f32[2,4,256], index: 0, kind: input, shape index: {}]   ;;  %s1165_s1 = inlined_call_operand.hbm [shape: bf16[5,32,32], index: 1, kind: input, shape index: {}]   ;;  %s1166_s2 = inlined_call_operand.vmem [shape: f32[2,28,256], index: 2, kind: output, shape index: {}]  }
   0x1   :  { %9 = vsyncpa [#allocation3 + $0x1], 0 }
   0x2   :  { %10 = vsyncpa [#allocation5], 0  ;;  %s1025_s9 = smov 0   ;;  %s1027_s10 = smov 0  }
   0x3   :  { %s1029_s11 = smov 0   ;;  %s1031_s12 = smov 0  }
   0x4   :  { %s1033_s13 = smov 0   ;;  %s1035_s14 = smov 0  }
   0x5 LB: > { %s759_s15 = sadd.s32 4294967295, %s1003_s14   ;;  %p50_p0 = scmp.ne.s32.totalorder %s987_s10, %s983_s9  ;;  %s1003_s14 = sphi %s1035_s14, %s16_s14   ;;  %s999_s13 = sphi %s1033_s13, %s1176_s13   ;;  %s995_s12 = sphi %s1031_s12, %s1175_s12   ;;  %s991_s11 = sphi %s1029_s11, %s1174_s11   ;;  %s987_s10 = sphi %s1027_s10, %s1173_s10   ;;  %s983_s9 = sphi %s1025_s9, %s1172_s9  }
   0x6   : > { %p1055_p1 = scmp.eq.s32.totalorder %s759_s15, 0  ;;  %p761_p2 = scmp.ge.s32.totalorder %s1003_s14, 1 }
   0x7   : > { %p110_p3 = scmp.lt.s32.totalorder %s1003_s14, 3  ;;  %s1005_s19 = smov [#allocation4]  }
   0x8   : > { %p1063_p4 = por %p1055_p1, %p50_p0  ;;  %s122_s20 = sshll.u32 %s1005_s19, 4  ;;  %s123_s20 = int_to_ptr.vmem [resolvable:$true] %s122_s20 }
   0x9   : > { %p1067_p5 = pnand %p761_p2, %p110_p3  ;;  %s28_s22 = sadd.s32 1, %s999_s13 }
   0xa   : > { %s906_s23 = scalar_lea.vmem %s123_s20, 1280  ;;  %p914_p12 = scmp.lt.s32.totalorder %s123_s20, %s123_s20 }
   0xb   : > { %p805_p6 = pneg %p1067_p5  ;;  %p907_p9 = scmp.ne.s32.totalorder %s123_s20, %s906_s23 }
   0xc   : > { %p915_p13 = scmp.lt.s32.totalorder %s906_s23, %s906_s23 }
   0xd   : > { %p1075_p7 = pnand %p805_p6, %p1055_p1 }
   0xe   : > { %p916_p0 = por %p915_p13, %p914_p12 }
   0xf   : > { %p897_p8 = pneg %p1075_p7 }
  0x11   : > { %p909_p10 = pnand %p907_p9, %p897_p8 }
  0x13   : > { %p910_p11 = pneg %p909_p10 }
  0x15   : > { %p917_p2 = pnand %p916_p0, %p910_p11 }
  0x17   : > { %920 = shalt.err (!%p917_p2)
}
  0x18   : > { %s1006_s24 = smov 64   ;;  %s1007_s25 = smov 4  }
  0x19   : > { %808 = dma.hbm_to_vmem [thread:$0]  (!%p1075_p7), %s1165_s1, 1280, %s123_s20, [#allocation5], %s1006_s24, %s1006_s24, %s1007_s25  }
  0x1a   : > { %p30_p3 = scmp.ge.s32.totalorder %s28_s22, 2  ;;  %s37_s28 = sadd.s32 1, %s991_s11 }
  0x1b   : > { %p44_p6 = scmp.ne.s32.totalorder %s991_s11, %s987_s10  ;;  %p45_p8 = scmp.eq.s32.totalorder %s1003_s14, 0 }
  0x1c   : > { %s1178_s22 = smov (%p30_p3, %s28_s22), 0  ;;  %p814_p10 = scmp.lt.s32.totalorder %s1003_s14, 2 }
  0x1d   : > { %p46_p9 = por %p45_p8, %p44_p6  ;;  %s32_s29 = ssub.s32 %s999_s13, %s1178_s22 }
  0x1e   : > { %s136_s30 = sand.u32 1, %s991_s11   ;;  %p35_p11 = scmp.eq.s32.totalorder %s32_s29, 0 }
  0x1f   : > { %s764_s3 = sshll.u32 %s136_s30, 3  ;;  %s795_s4 = sshll.u32 %s999_s13, 7 }
  0x20   : > { %s1099_s5 = scalar_select %p35_p11, %s991_s11, %s37_s28  }
  0x21   : > { %s148_s8 = scalar_lea.hbm %s1164_s0, %s795_s4  ;;  %s140_s9 = scalar_lea.vmem [#allocation2], %s764_s3 }
  0x22   : > { %s150_s15 = sshll.u32 %s140_s9, 4  ;;  %p1104_p7 = pnand %p814_p10, %p46_p9  ;;  %s151_s15 = int_to_ptr.vmem [resolvable:$true] %s150_s15 }
  0x23   : > { %s137_s20 = scalar_lea.sflag [#allocation3], %s136_s30  ;;  %s934_s21 = scalar_lea.vmem %s151_s15, 128 }
  0x24   : > { %p923_p12 = pneg %p1104_p7  ;;  %p935_p13 = scmp.ne.s32.totalorder %s151_s15, %s934_s21 }
  0x25   : > { %s1008_s23 = smov [#allocation2]  }
  0x26   : > { %p937_p0 = pnand %p935_p13, %p923_p12  ;;  %s939_s24 = sshll.u32 %s1008_s23, 4  ;;  %s940_s24 = int_to_ptr.vmem [resolvable:$false] %s939_s24 }
  0x27   : > { %s941_s25 = scalar_lea.vmem %s940_s24, 256  ;;  %p942_p3 = scmp.lt.s32.totalorder %s151_s15, %s940_s24 }
  0x28   : > { %p938_p2 = pneg %p937_p0  ;;  %p943_p6 = scmp.lt.s32.totalorder %s941_s25, %s934_s21 }
  0x2a   : > { %p944_p8 = por %p943_p6, %p942_p3 }
  0x2c   : > { %p945_p9 = pnand %p944_p8, %p938_p2 }
  0x2e   : > { %948 = shalt.err (!%p945_p9)
}
  0x2f   : > { %812 = dma.hbm_to_vmem [thread:$0]  (!%p1104_p7), %s148_s8, 128, %s151_s15, %s137_s20  }
  0x30   : > { %159 = sbr.rel (%p1067_p5) target bundleno = 1155 (0x483), region = 28  ;;  %s161_s26 = sand.u32 (!%p1067_p5), 1, %s987_s10  }
  0x31   : > { %s768_s27 = sshll.u32 (!%p1067_p5), %s161_s26, 3  ;;  %s162_s28 = scalar_lea.sflag (!%p1067_p5), [#allocation3], %s161_s26 }
  0x32   : > { %s165_s29 = scalar_lea.vmem (!%p1067_p5), [#allocation2], %s768_s27 }
  0x35   : > { %974 = dma.done.wait (%p1063_p4), %s162_s28, 128  }
  0x36   : > { %976 = vsyncadd (%p1063_p4), %s162_s28, 4294967168 }
  0x37   : > { %978 = dma.done.wait (%p1055_p1), [#allocation5], 1280  }
  0x38   : > { %980 = vsyncadd (%p1055_p1), [#allocation5], 4294966016  ;;  %v1009_v0 = vmov 0   ;;  %v206_v1 = vld [vmem:[%s165_s29] sm:$0xff]  ;;  %vm233_vm0 = vcmask 1041408   ;;  %vm226_vm1 = vcmask 31744  }
  0x39   : > { %272 = vmatprep.mubr.bf16.mxu0 %v1009_v0  ;;  %282 = vmatprep.mubr.bf16.mxu1 %v1009_v0  ;;  %v208_v2 = vcombine.high %v206_v1, %v206_v1  ;;  %v210_v3 = vpack.c.bf16 %v206_v1, %v206_v1  ;;  %v869_v6 = vld [vmem:[#allocation4] sm:$0xff]   ;;  %v870_v7 = vld [vmem:[#allocation4 + $0x8] sm:$0xff]   ;;  %v871_v28 = vld [vmem:[#allocation4 + $0x10] sm:$0xff]   ;;  %vm320_vm2 = vcmask 261120   ;;  %p196_p1 = scmp.lt.s32.totalorder %s995_s12, 1 }
  0x3a   : > { %v872_v29 = vld [vmem:[#allocation4 + $0x18] sm:$0xff]   ;;  %v873_v50 = vld [vmem:[#allocation4 + $0x20] sm:$0xff]   ;;  %v874_v51 = vld [vmem:[#allocation4 + $0x28] sm:$0xff]  }
  0x3b   : > { %v211_v4 = vpack.c.bf16 %v208_v2, %v208_v2  ;;  %v235_v5 = vsel %vm233_vm0, %v210_v3, 0  ;;  %s1180_s12 = smov (!%p196_p1, %s995_s12), 1 }
  0x3c   : > { %s796_s16 = sshll.u32 %s1180_s12, 6 }
  0x3d   : > { %774 = vmatprep.subr.msk.bf16.mxu0 %vm233_vm0, %v211_v4  ;;  %797 = vmatprep.subr.msk.bf16.mxu1 %vm233_vm0, %v211_v4  ;;  %s203_s30 = scalar_lea.vmem %s1166_s2, %s796_s16 }
  0x3e   : > { %255 = vmatpush1.bf16.msra.mxu0 %v235_v5  ;;  %798 = vmatpush1.bf16.msra.mxu1 %v235_v5 }
  0x41   : > { %775 = vmatmul.mubr.msk.bf16.vlgmr.msra.gmra.mxu0 %vm226_vm1, %v869_v6  ;;  %776 = vmatmul.mubr.msk.bf16.vlgmr.msra.gmra.mxu1 %vm226_vm1, %v870_v7 }
  0x42   : > { %359 = vmatprep.mubr.bf16.mxu1 %v1009_v0  ;;  %445 = vmatprep.mubr.bf16.mxu0 %v1009_v0 }
 0x101   : > { %v274_v8 = vpop.f32.mrf.mxu0  ;;  %v284_v9 = vpop.f32.mrf.mxu1 }
 0x102   : > { %v297_v20 = vmax.f32 %v284_v9, 0.0  ;;  %v293_v23 = vmax.f32 %v274_v8, 0.0  ;;  %v875_v9 = vld [vmem:[#allocation4 + $0x30] sm:$0xff]  }
 0x103   : > { %v276_v10 = vpop.f32.mrf.mxu0  ;;  %v286_v11 = vpop.f32.mrf.mxu1 }
 0x104   : > { %v298_v17 = vmax.f32 %v286_v11, 0.0  ;;  %v294_v21 = vmax.f32 %v276_v10, 0.0  ;;  %v876_v10 = vld [vmem:[#allocation4 + $0x38] sm:$0xff]  }
 0x105   : > { %v278_v12 = vpop.f32.mrf.mxu0  ;;  %v288_v13 = vpop.f32.mrf.mxu1 }
 0x106   : > { %v299_v14 = vmax.f32 %v288_v13, 0.0  ;;  %v295_v24 = vmax.f32 %v278_v12, 0.0 }
 0x107   : > { %v280_v15 = vpop.f32.mrf.mxu0  ;;  %v290_v16 = vpop.f32.mrf.mxu1 }
 0x108   : > { %v296_v18 = vmax.f32 %v280_v15, 0.0  ;;  %v300_v19 = vmax.f32 %v290_v16, 0.0  ;;  %v308_v25 = vpack.c.bf16 %v299_v14, %v297_v20  ;;  %v306_v27 = vpack.c.bf16 %v295_v24, %v293_v23 }
 0x10a   : > { %v309_v22 = vpack.c.bf16 %v300_v19, %v298_v17  ;;  %v307_v26 = vpack.c.bf16 %v296_v18, %v294_v21 }
 0x10c   : > { %339 = vmatprep.subr.bf16.mxu1 %v309_v22 }
 0x10d   : > { %340 = vmatpush1.bf16.msra.mxu1 %v308_v25 }
 0x10e   : > { %341 = vmatprep.subr.bf16.mxu1 %v307_v26 }
 0x111   : > { %342 = vmatpush1.bf16.msra.mxu1 %v306_v27 }
 0x114   : > { %779 = vmatmul.mubr.msk.bf16.vlgmr.msra.gmra.mxu1 %vm320_vm2, %v871_v28 }
 0x115   : > { %369 = vmatprep.mubr.bf16.mxu1 %v1009_v0 }
 0x11c   : > { %780 = vmatmul.mubr.msk.bf16.gmra.mxu1 %vm320_vm2, %v872_v29 }
 0x11d   : > { %531 = vmatprep.mubr.bf16.mxu1 %v1009_v0 }
 0x1d4   : > { %v361_v30 = vpop.f32.mrf.mxu1 }
 0x1d5   : > { %v380_v48 = vmax.f32 %v361_v30, 0.0 }
 0x1d6   : > { %v363_v31 = vpop.f32.mrf.mxu1 }
 0x1d7   : > { %v381_v43 = vmax.f32 %v363_v31, 0.0  ;;  %v877_v31 = vld [vmem:[#allocation4 + $0x40] sm:$0xff]  }
 0x1d8   : > { %v365_v32 = vpop.f32.mrf.mxu1 }
 0x1d9   : > { %v382_v45 = vmax.f32 %v365_v32, 0.0  ;;  %v878_v32 = vld [vmem:[#allocation4 + $0x48] sm:$0xff]  }
 0x1da   : > { %v367_v33 = vpop.f32.mrf.mxu1 }
 0x1db   : > { %v383_v39 = vmax.f32 %v367_v33, 0.0  ;;  %v393_v49 = vpack.c.bf16 %v382_v45, %v380_v48 }
 0x1dc   : > { %v371_v34 = vpop.f32.mrf.mxu1 }
 0x1dd   : > { %v384_v42 = vmax.f32 %v371_v34, 0.0  ;;  %v394_v47 = vpack.c.bf16 %v383_v39, %v381_v43 }
 0x1de   : > { %v373_v35 = vpop.f32.mrf.mxu1 }
 0x1df   : > { %v385_v40 = vmax.f32 %v373_v35, 0.0 }
 0x1e0   : > { %v375_v36 = vpop.f32.mrf.mxu1 }
 0x1e1   : > { %v386_v37 = vmax.f32 %v375_v36, 0.0 }
 0x1e2   : > { %v377_v38 = vpop.f32.mrf.mxu1 }
 0x1e3   : > { %v387_v41 = vmax.f32 %v377_v38, 0.0  ;;  %v395_v46 = vpack.c.bf16 %v386_v37, %v384_v42 }
 0x1e5   : > { %v396_v44 = vpack.c.bf16 %v387_v41, %v385_v40 }
 0x1e7   : > { %425 = vmatprep.subr.bf16.mxu0 %v396_v44 }
 0x1e8   : > { %426 = vmatpush1.bf16.msra.mxu0 %v395_v46 }
 0x1e9   : > { %427 = vmatprep.subr.bf16.mxu0 %v394_v47 }
 0x1ec   : > { %428 = vmatpush1.bf16.msra.mxu0 %v393_v49 }
 0x1ef   : > { %783 = vmatmul.mubr.msk.bf16.vlgmr.msra.gmra.mxu0 %vm320_vm2, %v873_v50 }
 0x1f0   : > { %455 = vmatprep.mubr.bf16.mxu0 %v1009_v0 }
 0x1f7   : > { %784 = vmatmul.mubr.msk.bf16.gmra.mxu0 %vm320_vm2, %v874_v51 }
 0x1f8   : > { %617 = vmatprep.mubr.bf16.mxu0 %v1009_v0 }
 0x2af   : > { %v447_v52 = vpop.f32.mrf.mxu0 }
 0x2b0   : > { %v466_v7 = vmax.f32 %v447_v52, 0.0 }
 0x2b1   : > { %v449_v53 = vpop.f32.mrf.mxu0 }
 0x2b2   : > { %v467_v2 = vmax.f32 %v449_v53, 0.0 }
 0x2b3   : > { %v451_v54 = vpop.f32.mrf.mxu0 }
 0x2b4   : > { %v468_v4 = vmax.f32 %v451_v54, 0.0 }
 0x2b5   : > { %v453_v55 = vpop.f32.mrf.mxu0 }
 0x2b6   : > { %v469_v61 = vmax.f32 %v453_v55, 0.0  ;;  %v479_v8 = vpack.c.bf16 %v468_v4, %v466_v7 }
 0x2b7   : > { %v457_v56 = vpop.f32.mrf.mxu0 }
 0x2b8   : > { %v470_v1 = vmax.f32 %v457_v56, 0.0  ;;  %v480_v6 = vpack.c.bf16 %v469_v61, %v467_v2 }
 0x2b9   : > { %v459_v57 = vpop.f32.mrf.mxu0 }
 0x2ba   : > { %v471_v62 = vmax.f32 %v459_v57, 0.0 }
 0x2bb   : > { %v461_v58 = vpop.f32.mrf.mxu0 }
 0x2bc   : > { %v472_v59 = vmax.f32 %v461_v58, 0.0 }
 0x2bd   : > { %v463_v60 = vpop.f32.mrf.mxu0 }
 0x2be   : > { %v473_v63 = vmax.f32 %v463_v60, 0.0  ;;  %v481_v5 = vpack.c.bf16 %v472_v59, %v470_v1 }
 0x2c0   : > { %v482_v3 = vpack.c.bf16 %v473_v63, %v471_v62 }
 0x2c2   : > { %511 = vmatprep.subr.bf16.mxu1 %v482_v3 }
 0x2c3   : > { %512 = vmatpush1.bf16.msra.mxu1 %v481_v5 }
 0x2c4   : > { %513 = vmatprep.subr.bf16.mxu1 %v480_v6 }
 0x2c7   : > { %514 = vmatpush1.bf16.msra.mxu1 %v479_v8 }
 0x2ca   : > { %787 = vmatmul.mubr.msk.bf16.vlgmr.msra.gmra.mxu1 %vm320_vm2, %v875_v9 }
 0x2cb   : > { %541 = vmatprep.mubr.bf16.mxu1 %v1009_v0 }
 0x2d2   : > { %788 = vmatmul.mubr.msk.bf16.gmra.mxu1 %vm320_vm2, %v876_v10 }
 0x38a   : > { %v533_v11 = vpop.f32.mrf.mxu1 }
 0x38b   : > { %v552_v29 = vmax.f32 %v533_v11, 0.0 }
 0x38c   : > { %v535_v12 = vpop.f32.mrf.mxu1 }
 0x38d   : > { %v553_v24 = vmax.f32 %v535_v12, 0.0 }
 0x38e   : > { %v537_v13 = vpop.f32.mrf.mxu1 }
 0x38f   : > { %v554_v26 = vmax.f32 %v537_v13, 0.0 }
 0x390   : > { %v539_v14 = vpop.f32.mrf.mxu1 }
 0x391   : > { %v555_v20 = vmax.f32 %v539_v14, 0.0  ;;  %v565_v30 = vpack.c.bf16 %v554_v26, %v552_v29 }
 0x392   : > { %v543_v15 = vpop.f32.mrf.mxu1 }
 0x393   : > { %v556_v23 = vmax.f32 %v543_v15, 0.0  ;;  %v566_v28 = vpack.c.bf16 %v555_v20, %v553_v24 }
 0x394   : > { %v545_v16 = vpop.f32.mrf.mxu1 }
 0x395   : > { %v557_v21 = vmax.f32 %v545_v16, 0.0 }
 0x396   : > { %v547_v17 = vpop.f32.mrf.mxu1 }
 0x397   : > { %v558_v18 = vmax.f32 %v547_v17, 0.0 }
 0x398   : > { %v549_v19 = vpop.f32.mrf.mxu1 }
 0x399   : > { %v559_v22 = vmax.f32 %v549_v19, 0.0  ;;  %v567_v27 = vpack.c.bf16 %v558_v18, %v556_v23 }
 0x39b   : > { %v568_v25 = vpack.c.bf16 %v559_v22, %v557_v21 }
 0x39d   : > { %597 = vmatprep.subr.bf16.mxu0 %v568_v25 }
 0x39e   : > { %598 = vmatpush1.bf16.msra.mxu0 %v567_v27 }
 0x39f   : > { %599 = vmatprep.subr.bf16.mxu0 %v566_v28 }
 0x3a2   : > { %600 = vmatpush1.bf16.msra.mxu0 %v565_v30 }
 0x3a5   : > { %791 = vmatmul.mubr.msk.bf16.vlgmr.msra.gmra.mxu0 %vm320_vm2, %v877_v31 }
 0x3a6   : > { %627 = vmatprep.mubr.bf16.mxu0 %v1009_v0 }
 0x3ad   : > { %792 = vmatmul.mubr.msk.bf16.gmra.mxu0 %vm320_vm2, %v878_v32 }
 0x465   : > { %v619_v33 = vpop.f32.mrf.mxu0 }
 0x466   : > { %879 = vtanh.f32 %v619_v33 }
 0x467   : > { %v621_v34 = vpop.f32.mrf.mxu0 }
 0x468   : > { %881 = vtanh.f32 %v621_v34 }
 0x469   : > { %v623_v35 = vpop.f32.mrf.mxu0 }
 0x46a   : > { %883 = vtanh.f32 %v623_v35 }
 0x46b   : > { %v625_v36 = vpop.f32.mrf.mxu0 }
 0x46c   : > { %885 = vtanh.f32 %v625_v36 }
 0x46d   : > { %v629_v37 = vpop.f32.mrf.mxu0 }
 0x46e   : > { %887 = vtanh.f32 %v629_v37 }
 0x46f   : > { %v631_v38 = vpop.f32.mrf.mxu0 }
 0x470   : > { %889 = vtanh.f32 %v631_v38 }
 0x471   : > { %v633_v0 = vpop.f32.mrf.mxu0 }
 0x472   : > { %891 = vtanh.f32 %v633_v0 }
 0x473   : > { %v880_v39 = vpop.eup %879  ;;  %v635_v40 = vpop.f32.mrf.mxu0 }
 0x474   : > { %646 = vst [vmem:[%s203_s30] sm:$0xff] %v880_v39  ;;  %893 = vtanh.f32 %v635_v40 }
 0x475   : > { %v882_v41 = vpop.eup %881 }
 0x476   : > { %647 = vst [vmem:[%s203_s30 + $0x8] sm:$0xff] %v882_v41 }
 0x477   : > { %v884_v42 = vpop.eup %883 }
 0x478   : > { %648 = vst [vmem:[%s203_s30 + $0x10] sm:$0xff] %v884_v42 }
 0x479   : > { %v886_v43 = vpop.eup %885 }
 0x47a   : > { %649 = vst [vmem:[%s203_s30 + $0x18] sm:$0xff] %v886_v43 }
 0x47b   : > { %v888_v44 = vpop.eup %887 }
 0x47c   : > { %650 = vst [vmem:[%s203_s30 + $0x20] sm:$0xff] %v888_v44 }
 0x47d   : > { %v890_v45 = vpop.eup %889 }
 0x47e   : > { %651 = vst [vmem:[%s203_s30 + $0x28] sm:$0xff] %v890_v45 }
 0x47f   : > { %v892_v46 = vpop.eup %891 }
 0x480   : > { %652 = vst [vmem:[%s203_s30 + $0x30] sm:$0xf] %v892_v46 }
 0x481   : > { %v894_v47 = vpop.eup %893 }
 0x482   : > { %653 = vst [vmem:[%s203_s30 + $0x38] sm:$0xf] %v894_v47 }
 0x483 PF: > { %s16_s14 = sadd.s32 1, %s1003_s14   ;;  %s1172_s9 = smov %s987_s10 }
 0x484   : > { %p13_p4 = scmp.ge.s32.totalorder %s16_s14, 4   ;;  %s1173_s10 = smov %s991_s11 }
 0x485   : > { %s1174_s11 = smov %s1099_s5  ;;  %s1175_s12 = smov %s999_s13 }
 0x486   : > { %s1176_s13 = smov %s1178_s22  ;;  %15 = sbr.rel (!%p13_p4) target bundleno = 5 (0x5), region = 76 }
 0x48b   :  { %684 = vsyncpa [#allocation3], 1 }
 0x48c   :  { %686 = vsyncpa [#allocation3 + $0x1], 1 }
 0x48d   :  { %687 = vsyncpa [#allocation5], 1 }

</bundles_post_ra>
